<compile_context>
chip_gen: v7x
topology: tpu7x:2x2x1
jax: 0.10.0
libtpu: 0.0.40
codegen_flags: <defaults>
</compile_context>

<pallas_src>
import functools
from dataclasses import dataclass

import jax
import jax.numpy as jnp
from jax.experimental import pallas as pl
from jax.experimental.pallas import tpu as pltpu


@dataclass
class GemmaConfig:
    vocab_size: int = 257216
    hidden_size: int = 2048
    intermediate_size: int = 16384
    num_hidden_layers: int = 18
    num_attention_heads: int = 8
    num_key_value_head: int = 1
    head_dim: int = 256
    max_position_embeddings: int = 8192
    rms_norm_eps: float = 1e-06
    rope_theta: float = 10000.0
    attention_bias: bool = False
    attention_dropout: float = 0.0
    pad_token_id: int = 0


@functools.lru_cache(maxsize=None)
def _inv_freq(head_dim: int, rope_theta: float):
    """inv_freq built once per config, exactly as the module's __init__."""
    dh2 = head_dim // 2
    inv = 1.0 / (
        rope_theta ** (jnp.arange(0, head_dim, 2, dtype=jnp.float32) / head_dim)
    )
    return inv.reshape(1, dh2)  # [1, Dh2]


def _choose_seq_tile(seq_len: int) -> int:
    """Largest sequence tile <= 1024 that evenly divides S (1024 keeps the
    double-buffered cos+sin blocks at ~4 MiB -> safe on v7x/v5e/v6e)."""
    if seq_len <= 1024:
        return seq_len
    for ts in (1024, 512, 256, 128, 64, 32, 16, 8):
        if seq_len % ts == 0:
            return ts
    return seq_len  # odd long S: single block per batch (rare fallback)


def _rope_kernel(pos_ref, inv_ref, cos_ref, sin_ref, *, dh2):
    # pos_ref : (1, tS, 1)       position slice for this (batch, seq-tile)
    # inv_ref : (1, dh2)         shared inv_freq row
    # cos_ref / sin_ref : (1, tS, 2*dh2) output blocks
    pos = pos_ref[0].astype(jnp.float32)          # [tS, 1]   in-kernel cast
    inv = inv_ref[...]                            # [1, dh2]
    freqs = pos * inv                             # [tS, dh2] VPU outer product

    c = jnp.cos(freqs)                            # EUP, half-width only
    s = jnp.sin(freqs)

    # Duplicate into both lane-aligned halves (== concat(freqs, freqs)).
    cos_ref[0, :, :dh2] = c
    cos_ref[0, :, dh2:] = c
    sin_ref[0, :, :dh2] = s
    sin_ref[0, :, dh2:] = s


def gemma_rotary_embedding(position_ids, config: GemmaConfig = GemmaConfig()):
    """position_ids: [B, S] (int or float). Returns (cos, sin), each
    [B, S, head_dim] float32."""
    head_dim = config.head_dim
    dh2 = head_dim // 2

    inv_freq = _inv_freq(head_dim, float(config.rope_theta))  # [1, dh2]

    B, S = position_ids.shape
    # Trailing unit-dim reshape is layout-compatible (no HBM copy); it puts
    # positions on the sublane axis so the outer product is a pure broadcast.
    pos3 = position_ids.reshape(B, S, 1)

    ts = _choose_seq_tile(S)
    grid = (B, S // ts)

    out_sds = jax.ShapeDtypeStruct((B, S, head_dim), jnp.float32)

    # HBM-write-bound streaming kernel: outputs dominate bytes_accessed.
    cost = pl.CostEstimate(
        flops=B * S * dh2,
        transcendentals=2 * B * S * dh2,                 # cos + sin (deduped)
        bytes_accessed=2 * B * S * head_dim * 4 + B * S * 4 + dh2 * 4,
    )

    # Per-step VMEM footprint (cos+sin, double-buffered). Only raise the
    # scoped-VMEM limit if the fallback (untileable S) needs it.
    block_bytes = 2 * 2 * ts * head_dim * 4
    cp_kwargs = dict(dimension_semantics=("parallel", "parallel"))
    if block_bytes > 24 * 1024 * 1024:
        cp_kwargs["vmem_limit_bytes"] = min(2 * block_bytes, 100 * 1024 * 1024)

    cos, sin = pl.pallas_call(
        functools.partial(_rope_kernel, dh2=dh2),
        out_shape=(out_sds, out_sds),
        grid_spec=pltpu.PrefetchScalarGridSpec(
            num_scalar_prefetch=0,
            grid=grid,
            in_specs=[
                pl.BlockSpec((1, ts, 1), lambda b, s: (b, s, 0)),
                pl.BlockSpec((1, dh2), lambda b, s: (0, 0)),
            ],
            out_specs=[
                pl.BlockSpec((1, ts, head_dim), lambda b, s: (b, s, 0)),
                pl.BlockSpec((1, ts, head_dim), lambda b, s: (b, s, 0)),
            ],
        ),
        compiler_params=pltpu.CompilerParams(**cp_kwargs),
        cost_estimate=cost,
    )(pos3, inv_freq)
    return cos, sin


if __name__ == "__main__":
    cfg = GemmaConfig()  # head_dim = 256 -> 128 frequencies (one full lane)
    B, S = 2, 8

    key = jax.random.PRNGKey(0)
    position_ids = jax.random.randint(
        key, (B, S), 0, cfg.max_position_embeddings, dtype=jnp.int32
    )

    cos, sin = gemma_rotary_embedding(position_ids, cfg)
    jax.block_until_ready((cos, sin))

    # Pure-JAX reference (same math as the PyTorch forward).
    inv_freq = 1.0 / (
        cfg.rope_theta
        ** (jnp.arange(0, cfg.head_dim, 2, dtype=jnp.float32) / cfg.head_dim)
    )
    freqs_ref = position_ids.astype(jnp.float32)[:, :, None] * inv_freq[None, None, :]
    emb_ref = jnp.concatenate([freqs_ref, freqs_ref], axis=-1)
    assert cos.shape == (B, S, cfg.head_dim) and sin.shape == (B, S, cfg.head_dim)
    assert jnp.allclose(cos, jnp.cos(emb_ref), atol=1e-5)
    assert jnp.allclose(sin, jnp.sin(emb_ref), atol=1e-5)

    print("KERNEL_OK")
</pallas_src>

<mosaic_0001>
module attributes {stable_mosaic.version = 11 : i64} {
  func.func @_rope_kernel(%arg0: i32, %arg1: i32, %arg2: memref<1x8x1xi32, #tpu.memory_space<vmem>>, %arg3: memref<1x128xf32, #tpu.memory_space<vmem>>, %arg4: memref<1x8x256xf32, #tpu.memory_space<vmem>>, %arg5: memref<1x8x256xf32, #tpu.memory_space<vmem>>) attributes {dimension_semantics = [#tpu.dimension_semantics<parallel>, #tpu.dimension_semantics<parallel>], iteration_bounds = array<i64: 2, 1>, scalar_prefetch = 0 : i64, scratch_operands = 0 : i64, tpu.core_type = #tpu.core_type<tc>, window_params = [{transform_indices = @transform_0, window_bounds = array<i64: 1, 8, 1>}, {pipeline_mode = #tpu.pipeline_mode<synchronous>, transform_indices = @transform_1, window_bounds = array<i64: 1, 128>}, {transform_indices = @transform_2, window_bounds = array<i64: 1, 8, 256>}, {transform_indices = @transform_3, window_bounds = array<i64: 1, 8, 256>}]} {
    %c0 = arith.constant 0 : index
    %c0_0 = arith.constant 0 : index
    %c0_1 = arith.constant 0 : index
    %0 = vector.load %arg2[%c0, %c0_0, %c0_1] : memref<1x8x1xi32, #tpu.memory_space<vmem>>, vector<1x8x1xi32>
    %1 = vector.shape_cast %0 : vector<1x8x1xi32> to vector<8x1xi32>
    %2 = arith.sitofp %1 : vector<8x1xi32> to vector<8x1xf32>
    %c0_2 = arith.constant 0 : index
    %c0_3 = arith.constant 0 : index
    %3 = vector.load %arg3[%c0_2, %c0_3] : memref<1x128xf32, #tpu.memory_space<vmem>>, vector<1x128xf32>
    %4 = vector.broadcast %2 : vector<8x1xf32> to vector<8x128xf32>
    %5 = vector.broadcast %3 : vector<1x128xf32> to vector<8x128xf32>
    %6 = arith.mulf %4, %5 : vector<8x128xf32>
    %7 = math.cos %6 : vector<8x128xf32>
    %8 = math.sin %6 : vector<8x128xf32>
    %c0_4 = arith.constant 0 : index
    %c0_5 = arith.constant 0 : index
    %c0_6 = arith.constant 0 : index
    %9 = vector.load %arg4[%c0_4, %c0_5, %c0_6] : memref<1x8x256xf32, #tpu.memory_space<vmem>>, vector<1x8x128xf32>
    %10 = vector.shape_cast %9 : vector<1x8x128xf32> to vector<8x128xf32>
    %11 = vector.shape_cast %7 : vector<8x128xf32> to vector<1x8x128xf32>
    tpu.vector_store %arg4[%c0_4, %c0_5, %c0_6], %11 {strides = array<i32>} : memref<1x8x256xf32, #tpu.memory_space<vmem>>, vector<1x8x128xf32>,
    %c0_7 = arith.constant 0 : index
    %c0_8 = arith.constant 0 : index
    %c128 = arith.constant 128 : index
    %12 = vector.load %arg4[%c0_7, %c0_8, %c128] : memref<1x8x256xf32, #tpu.memory_space<vmem>>, vector<1x8x128xf32>
    %13 = vector.shape_cast %12 : vector<1x8x128xf32> to vector<8x128xf32>
    %14 = vector.shape_cast %7 : vector<8x128xf32> to vector<1x8x128xf32>
    tpu.vector_store %arg4[%c0_7, %c0_8, %c128], %14 {strides = array<i32>} : memref<1x8x256xf32, #tpu.memory_space<vmem>>, vector<1x8x128xf32>,
    %c0_9 = arith.constant 0 : index
    %c0_10 = arith.constant 0 : index
    %c0_11 = arith.constant 0 : index
    %15 = vector.load %arg5[%c0_9, %c0_10, %c0_11] : memref<1x8x256xf32, #tpu.memory_space<vmem>>, vector<1x8x128xf32>
    %16 = vector.shape_cast %15 : vector<1x8x128xf32> to vector<8x128xf32>
    %17 = vector.shape_cast %8 : vector<8x128xf32> to vector<1x8x128xf32>
    tpu.vector_store %arg5[%c0_9, %c0_10, %c0_11], %17 {strides = array<i32>} : memref<1x8x256xf32, #tpu.memory_space<vmem>>, vector<1x8x128xf32>,
    %c0_12 = arith.constant 0 : index
    %c0_13 = arith.constant 0 : index
    %c128_14 = arith.constant 128 : index
    %18 = vector.load %arg5[%c0_12, %c0_13, %c128_14] : memref<1x8x256xf32, #tpu.memory_space<vmem>>, vector<1x8x128xf32>
    %19 = vector.shape_cast %18 : vector<1x8x128xf32> to vector<8x128xf32>
    %20 = vector.shape_cast %8 : vector<8x128xf32> to vector<1x8x128xf32>
    tpu.vector_store %arg5[%c0_12, %c0_13, %c128_14], %20 {strides = array<i32>} : memref<1x8x256xf32, #tpu.memory_space<vmem>>, vector<1x8x128xf32>,
    return
  }
  func.func @transform_0(%arg0: i32, %arg1: i32) -> (i32, i32, i32) {
    %c0_i32 = arith.constant 0 : i32
    %c0_i32_0 = arith.constant 0 : i32
    return %arg0, %arg1, %c0_i32 : i32, i32, i32
  }
  func.func @transform_1(%arg0: i32, %arg1: i32) -> (i32, i32) {
    %c0_i32 = arith.constant 0 : i32
    %c0_i32_0 = arith.constant 0 : i32
    %c0_i32_1 = arith.constant 0 : i32
    return %c0_i32, %c0_i32_0 : i32, i32
  }
  func.func @transform_2(%arg0: i32, %arg1: i32) -> (i32, i32, i32) {
    %c0_i32 = arith.constant 0 : i32
    %c0_i32_0 = arith.constant 0 : i32
    return %arg0, %arg1, %c0_i32 : i32, i32, i32
  }
  func.func @transform_3(%arg0: i32, %arg1: i32) -> (i32, i32, i32) {
    %c0_i32 = arith.constant 0 : i32
    %c0_i32_0 = arith.constant 0 : i32
    return %arg0, %arg1, %c0_i32 : i32, i32, i32
  }
}

</mosaic_0001>

<bundles_post_ra>
// kernel: tpu_custom_call.1
= control target key start
LH: loop header
LB: loop body
LE: loop exit
PB: predicated region body
PF: predicated region fallthrough
CT: control target
= control target key end

     0   :  { %9 = vsyncpa [#allocation3], 0  ;;  %s989_s0 = inlined_call_operand.vmem [shape: s32[2,8,1], index: 0, kind: input, shape index: {}]   ;;  %s990_s1 = inlined_call_operand.vmem [shape: f32[1,128], index: 1, kind: input, shape index: {}]   ;;  %s991_s2 = inlined_call_operand.hbm [shape: f32[2,8,256], index: 2, kind: output, shape index: {0}]   ;;  %s992_s3 = inlined_call_operand.hbm [shape: f32[2,8,256], index: 3, kind: output, shape index: {1}]  }
   0x1   :  { %11 = vsyncpa [#allocation3 + $0x1], 0 }
   0x2   :  { %12 = vsyncpa [#allocation5], 0 }
   0x3   :  { %14 = vsyncpa [#allocation5 + $0x1], 0  ;;  %s820_s12 = smov 0   ;;  %s822_s13 = smov 0  }
   0x4   :  { %s824_s14 = smov 0   ;;  %s826_s15 = smov 0  }
   0x5   :  { %s828_s16 = smov 0   ;;  %s830_s17 = smov 0  }
   0x6 LB: > { %s576_s18 = sadd.s32 4294967295, %s789_s17   ;;  %s577_s19 = sadd.s32 4294967294, %s789_s17   ;;  %s789_s17 = sphi %s830_s17, %s20_s17   ;;  %s785_s16 = sphi %s828_s16, %s999_s16   ;;  %s781_s15 = sphi %s826_s15, %s998_s15   ;;  %s777_s14 = sphi %s824_s14, %s997_s14   ;;  %s773_s13 = sphi %s822_s13, %s996_s13   ;;  %s769_s12 = sphi %s820_s12, %s995_s12  }
   0x7   : > { %s32_s20 = sadd.s32 1, %s785_s16  ;;  %s90_s21 = sadd.s32 1, %s777_s14 }
   0x8   : > { %p34_p0 = scmp.ge.s32.totalorder %s32_s20, 2  ;;  %p100_p1 = scmp.ne.s32.totalorder %s777_s14, %s773_s13 }
   0x9   : > { %p101_p2 = scmp.eq.s32.totalorder %s576_s18, 1  ;;  %p106_p3 = scmp.ne.s32.totalorder %s773_s13, %s769_s12 }
   0xa   : > { %s1001_s20 = smov (%p34_p0, %s32_s20), 0  ;;  %p107_p5 = scmp.eq.s32.totalorder %s577_s19, 1 }
   0xb   : > { %p860_p4 = por %p101_p2, %p100_p1  ;;  %s85_s23 = ssub.s32 %s785_s16, %s1001_s20 }
   0xc   : > { %p580_p6 = scmp.ge.s32.totalorder %s789_s17, 1  ;;  %p88_p7 = scmp.eq.s32.totalorder %s85_s23, 0 }
   0xd   : > { %p867_p8 = por %p107_p5, %p106_p3  ;;  %p166_p9 = scmp.lt.s32.totalorder %s789_s17, 3 }
   0xe   : > { %s873_s25 = scalar_select %p88_p7, %s777_s14, %s90_s21  }
   0xf   : > { %p167_p10 = pnand %p580_p6, %p166_p9 }
  0x10   : > { %p197_p11 = scmp.lt.s32.totalorder (!%p167_p10), %s781_s15, 1  ;;  %v791_v0 = vmov (!%p167_p10), 0   ;;  %v584_v3 = vld [vmem:[%s990_s1] ss:$0 sm:$0xff] (!%p167_p10)  ;;  %v792_v16 = vmov (!%p167_p10), 683565275  }
  0x11   : > { %170 = sbr.rel (%p167_p10) target bundleno = 278 (0x116), region = 28  ;;  %674 = vset.pattern.permute.xlu0 (!%p167_p10), %v791_v0  ;;  %v793_v18 = vmov (!%p167_p10), 2475754826   ;;  %v794_v21 = vmov (!%p167_p10), 2131351028   ;;  %s904_s6 = sand.u32 (!%p167_p10), 1, %s773_s13  }
  0x12   : > { %v795_v24 = vmov (!%p167_p10), 2102212464   ;;  %v796_v27 = vmov (!%p167_p10), 920167782   ;;  %v797_v30 = vmov (!%p167_p10), 1326507024  }
  0x13   : > { %s581_s7 = sshll.u32 (!%p167_p10), %s904_s6, 4  ;;  %s601_s8 = sshll.u32 (!%p167_p10), %s781_s15, 8 }
  0x14   : > { %s189_s9 = scalar_lea.vmem (!%p167_p10), [#allocation2], %s581_s7  ;;  %s196_s11 = scalar_lea.vmem (!%p167_p10), [#allocation4], %s581_s7 }
  0x15   : > { %s452_s10 = sshll.u32 (!%p167_p10), %s189_s9, 4  ;;  %s468_s18 = sshll.u32 (!%p167_p10), %s196_s11, 4  ;;  %s914_s10 = int_to_ptr.vmem [resolvable:$true] %s452_s10  ;;  %s921_s18 = int_to_ptr.vmem [resolvable:$true] %s468_s18 }
  0x16   : > { %s911_s23 = scalar_lea.hbm (!%p167_p10), %s991_s2, %s601_s8  ;;  %s431_s28 = scalar_lea.sflag (!%p167_p10), [#allocation3], %s904_s6 }
  0x17   : > { %s679_s29 = scalar_lea.vmem (!%p167_p10), %s914_s10, 256 }
  0x18   : > { %s198_s26 = scalar_select %p197_p11, %s781_s15, 1 }
  0x19   : > { %p680_p12 = scmp.ne.s32.totalorder %s914_s10, %s679_s29 }
  0x1a   : > { %s583_s27 = sshll.u32 %s198_s26, 3 }
  0x1b   : > { %s203_s30 = scalar_lea.vmem %s989_s0, %s583_s27  ;;  %s919_s27 = scalar_lea.hbm %s992_s3, %s601_s8 }
  0x1c   : > { %v204_v1 = vld [vmem:[%s203_s30] sm:$0xff]  ;;  %p681_p13 = pnand %p680_p12, %p860_p4  ;;  %s798_s30 = smov [#allocation2]  }
  0x1d   : > { %v205_v2 = vcvt.s32.f32 %v204_v1  ;;  %s683_s4 = sshll.u32 %s798_s30, 4  ;;  %s684_s4 = int_to_ptr.vmem [resolvable:$false] %s683_s4 }
  0x1e   : > { %p682_p0 = pneg %p681_p13  ;;  %s685_s5 = scalar_lea.vmem %s684_s4, 512 }
  0x1f   : > { %209 = vperm.xlu0 %674, %v205_v2   ;;  %p686_p1 = scmp.lt.s32.totalorder %s914_s10, %s684_s4  ;;  %p687_p2 = scmp.lt.s32.totalorder %s685_s5, %s679_s29 }
  0x21   : > { %p688_p3 = por %p687_p2, %p686_p1 }
  0x23   : > { %p689_p5 = pnand %p688_p3, %p682_p0 }
  0x9e   : > { %v210_v4 = vpop.permute.xlu0 %209 }
  0x9f   : > { %v883_v5 = vmul.f32 %v584_v3, %v210_v4 }
  0xa1   : > { %v222_v6 = vand.u32 2139095040, %v883_v5  ;;  %v219_v10 = vand.u32 2147483647, %v883_v5  ;;  %vm221_vm7 = vcmp.lt.s32.totalorder %v883_v5, 0  ;;  %vm311_vm15 = vweird.f32 %v883_v5 }
  0xa3   : > { %v223_v7 = vshrl.u32 %v222_v6, 23  ;;  %v226_v13 = vand.u32 8388607, %v219_v10  ;;  %vm220_vm8 = vcmp.le.f32.partialorder %v219_v10, 0.7853982 }
  0xa5   : > { %v585_v8 = vadd.s32 4294967169, %v223_v7  ;;  %v227_v32 = vor.u32 8388608, %v226_v13 }
  0xa7   : > { %v229_v9 = vadd.s32 1, %v585_v8  ;;  %v267_v46 = vshll.u32 %v227_v32, 8 }
  0xa9   : > { %vm230_vm0 = vcmp.gt.s32.totalorder %v229_v9, 0 }
  0xaa   : > { %v231_v11 = vsel %vm230_vm0, %v229_v9, 0 }
  0xab   : > { %v233_v12 = vand.u32 31, %v231_v11  ;;  %v232_v15 = vshrl.u32 %v231_v11, 5 }
  0xad   : > { %v234_v14 = vsub.s32 32, %v233_v12  ;;  %v236_v17 = vshll.u32 %v792_v16, %v233_v12  ;;  %v239_v19 = vshll.u32 %v793_v18, %v233_v12  ;;  %v242_v23 = vshll.u32 %v794_v21, %v233_v12 }
  0xae   : > { %v245_v26 = vshll.u32 %v795_v24, %v233_v12  ;;  %v248_v29 = vshll.u32 %v796_v27, %v233_v12  ;;  %vm251_vm1 = vcmp.lt.s32.totalorder %v232_v15, 1  ;;  %vm254_vm2 = vcmp.lt.s32.totalorder %v232_v15, 4 }
  0xaf   : > { %v237_v20 = vshrl.u32 %v793_v18, %v234_v14  ;;  %v240_v22 = vshrl.u32 %v794_v21, %v234_v14  ;;  %v243_v25 = vshrl.u32 %v795_v24, %v234_v14  ;;  %v246_v28 = vshrl.u32 %v796_v27, %v234_v14 }
  0xb0   : > { %v249_v31 = vshrl.u32 %v797_v30, %v234_v14  ;;  %v235_v41 = vshrl.u32 %v792_v16, %v234_v14  ;;  %vm253_vm3 = vcmp.lt.s32.totalorder %v232_v15, 3  ;;  %vm252_vm4 = vcmp.lt.s32.totalorder %v232_v15, 2 }
  0xb1   : > { %v238_v33 = vor.u32 %v237_v20, %v236_v17  ;;  %v241_v34 = vor.u32 %v240_v22, %v239_v19  ;;  %v244_v35 = vor.u32 %v243_v25, %v242_v23  ;;  %v247_v36 = vor.u32 %v246_v28, %v245_v26 }
  0xb2   : > { %v250_v37 = vor.u32 %v249_v31, %v248_v29 }
  0xb3   : > { %v256_v38 = vsel %vm254_vm2, %v244_v35, 2102212464  ;;  %v259_v39 = vsel %vm251_vm1, %v238_v33, %v241_v34  ;;  %v263_v40 = vsel %vm251_vm1, %v241_v34, %v244_v35  ;;  %v260_v42 = vsel %vm254_vm2, %v247_v36, 920167782 }
  0xb4   : > { %v264_v43 = vsel %vm254_vm2, %v250_v37, 1326507024  ;;  %v261_v44 = vsel %vm253_vm3, %v244_v35, %v260_v42  ;;  %v255_v47 = vsel %vm251_vm1, %v235_v41, %v238_v33  ;;  %v257_v48 = vsel %vm253_vm3, %v241_v34, %v256_v38 }
  0xb5   : > { %v265_v45 = vsel %vm253_vm3, %v247_v36, %v264_v43  ;;  %v262_v49 = vsel %vm252_vm4, %v259_v39, %v261_v44  ;;  %v258_v55 = vsel %vm252_vm4, %v255_v47, %v257_v48 }
  0xb6   : > { %v266_v50 = vsel %vm252_vm4, %v263_v40, %v265_v45  ;;  %v892_v53 = vmul.u32.u64.low %v267_v46, %v262_v49  ;;  %v893_v54 = vmul.u32.u64.high %v267_v46, %v262_v49, %v892_v53  ;;  %v274_v57 = vmul.u32 %v267_v46, %v258_v55 }
  0xb7   : > { %v889_v51 = vmul.u32.u64.low %v267_v46, %v266_v50  ;;  %v890_v52 = vmul.u32.u64.high %v267_v46, %v266_v50, %v889_v51 }
  0xb8   : > { %v277_v56 = vadd.s32 1, %v893_v54 }
  0xb9   : > { %vm276_vm5 = vc.u32 %v890_v52, %v892_v53  ;;  %v275_v6 = vadd.s32 %v892_v53, %v890_v52 }
  0xba   : > { %v278_v58 = vsel %vm276_vm5, %v277_v56, %v893_v54 }
  0xbb   : > { %v279_v59 = vadd.s32 %v278_v58, %v274_v57 }
  0xbd   : > { %v280_v60 = vadd.s32 536870912, %v279_v59 }
  0xbf   : > { %v281_v61 = vshrl.u32 %v280_v60, 30 }
  0xc1   : > { %v282_v62 = vshll.u32 %v281_v61, 30  ;;  %v305_v19 = vsub.s32 4, %v281_v61 }
  0xc3   : > { %v283_v63 = vsub.s32 %v279_v59, %v282_v62  ;;  %v306_v22 = vsel %vm221_vm7, %v305_v19, %v281_v61 }
  0xc4   : > { %v308_v24 = vsel %vm220_vm8, 0, %v306_v22 }
  0xc5   : > { %v285_v0 = vsub.s32 0, %v283_v63  ;;  %v415_v25 = vadd.s32 3, %v308_v24  ;;  %v312_v26 = vand.u32 3, %v308_v24 }
  0xc7   : > { %v586_v1 = vmin.u32 %v285_v0, %v283_v63  ;;  %v416_v27 = vand.u32 3, %v415_v25  ;;  %vm317_vm9 = vcmp.eq.s32.totalorder %v312_v26, 2  ;;  %vm314_vm11 = vcmp.eq.s32.totalorder %v312_v26, 0 }
  0xc8   : > { %vm313_vm13 = vcmp.lt.s32.totalorder %v312_v26, 2 }
  0xc9   : > { %v287_v2 = vclz %v586_v1  ;;  %vm421_vm10 = vcmp.eq.s32.totalorder %v416_v27, 2  ;;  %vm418_vm12 = vcmp.eq.s32.totalorder %v416_v27, 0  ;;  %vm417_vm14 = vcmp.lt.s32.totalorder %v416_v27, 2 }
  0xcb   : > { %v587_v3 = vadd.s32 4294967294, %v287_v2 }
  0xcd   : > { %vm588_vm6 = vcmp.lt.s32.totalorder %v587_v3, 0 }
  0xce   : > { %v290_v4 = vsel %vm588_vm6, 0, %v587_v3 }
  0xcf   : > { %v291_v7 = vsub.s32 32, %v290_v4  ;;  %v295_v8 = vsub.s32 4294967266, %v290_v4  ;;  %v292_v9 = vshll.u32 %v283_v63, %v290_v4 }
  0xd1   : > { %v293_v11 = vshrl.u32 %v275_v6, %v291_v7  ;;  %v296_v12 = vadd.s32 127, %v295_v8 }
  0xd3   : > { %v294_v13 = vor.u32 %v293_v11, %v292_v9  ;;  %v297_v14 = vshll.u32 %v296_v12, 23 }
  0xd5   : > { %v298_v15 = vor.u32 4788187, %v297_v14  ;;  %v301_v17 = vcvt.s32.f32 %v294_v13 }
  0xd7   : > { %v299_v16 = vand.u32 2147483647, %v298_v15 }
  0xd9   : > { %v302_v18 = vmul.f32 %v301_v17, %v299_v16 }
  0xdb   : > { %v303_v20 = vxor.u32 2147483648, %v302_v18 }
  0xdd   : > { %v304_v21 = vsel %vm221_vm7, %v303_v20, %v302_v18 }
  0xde   : > { %v307_v23 = vsel %vm220_vm8, %v883_v5, %v304_v21 }
  0xdf   : > { %675 = vcosq.f32 %v307_v23 }
  0xe0   : > { %677 = vsinq.f32 %v307_v23 }
  0xe9   : > { %v676_v28 = vpop.eup %675 }
  0xea   : > { %v678_v29 = vpop.eup %677  ;;  %v318_v30 = vxor.u32 2147483648, %v676_v28 }
  0xeb   : > { %v315_v31 = vxor.u32 2147483648, %v678_v29 }
  0xec   : > { %v319_v10 = vsel %vm317_vm9, %v318_v30, %v678_v29  ;;  %v423_v32 = vsel %vm421_vm10, %v318_v30, %v678_v29 }
  0xed   : > { %v316_v33 = vsel %vm314_vm11, %v676_v28, %v315_v31  ;;  %v420_v34 = vsel %vm418_vm12, %v676_v28, %v315_v31 }
  0xee   : > { %v320_v35 = vsel %vm313_vm13, %v316_v33, %v319_v10  ;;  %v424_v36 = vsel %vm417_vm14, %v420_v34, %v423_v32 }
  0xef   : > { %v321_v37 = vsel %vm311_vm15, nan, %v320_v35  ;;  %v425_v38 = vsel %vm311_vm15, nan, %v424_v36 }
  0xf0   : > { %426 = vst [vmem:[%s189_s9] sm:$0xff] %v321_v37  ;;  %427 = vst [vmem:[%s189_s9 + $0x8] sm:$0xff] %v321_v37 }
  0xf1   : > { %428 = vst [vmem:[%s196_s11] sm:$0xff] %v425_v38  ;;  %429 = vst [vmem:[%s196_s11 + $0x8] sm:$0xff] %v425_v38 }
  0xf2   : > { %692 = shalt.err (!%p689_p5)
}
  0xf3   : > { %s693_s7 = scalar_lea.hbm %s911_s23, 256  ;;  %s697_s11 = scalar_lea.hbm %s991_s2, 512 }
  0xf4   : > { %p694_p6 = scmp.ne.s32.totalorder %s911_s23, %s693_s7  ;;  %p698_p10 = scmp.lt.u32.totalorder %s911_s23, %s991_s2 }
  0xf5   : > { %p699_p11 = scmp.lt.u32.totalorder %s697_s11, %s693_s7  ;;  %p701_p13 = scmp.lt.u32.totalorder %s693_s7, %s911_s23 }
  0xf6   : > { %p695_p7 = pnand %p694_p6, %p860_p4 }
  0xf7   : > { %p700_p12 = por %p699_p11, %p698_p10 }
  0xf8   : > { %p696_p9 = pneg %p695_p7 }
  0xf9   : > { %p702_p0 = por %p701_p13, %p700_p12 }
  0xfb   : > { %p703_p1 = pnand %p702_p0, %p696_p9 }
  0xfd   : > { %706 = shalt.err (!%p703_p1)
}
  0xfe   : > { %607 = dma.vmem_to_hbm [thread:$0]  (%p860_p4), %s914_s10, 256, %s911_s23, %s431_s28  }
  0xff   : > { %s436_s15 = scalar_lea.sflag [#allocation5], %s904_s6  ;;  %s707_s26 = scalar_lea.vmem %s921_s18, 256 }
 0x100   : > { %p708_p2 = scmp.ne.s32.totalorder %s921_s18, %s707_s26  ;;  %s799_s29 = smov [#allocation4]  }
 0x101   : > { %s711_s30 = sshll.u32 %s799_s29, 4  ;;  %s712_s30 = int_to_ptr.vmem [resolvable:$false] %s711_s30 }
 0x102   : > { %p709_p3 = pnand %p708_p2, %p860_p4  ;;  %s713_s4 = scalar_lea.vmem %s712_s30, 512 }
 0x103   : > { %p714_p6 = scmp.lt.s32.totalorder %s921_s18, %s712_s30  ;;  %p715_p7 = scmp.lt.s32.totalorder %s713_s4, %s707_s26 }
 0x104   : > { %p710_p5 = pneg %p709_p3 }
 0x105   : > { %p716_p9 = por %p715_p7, %p714_p6 }
 0x107   : > { %p717_p10 = pnand %p716_p9, %p710_p5 }
 0x109   : > { %720 = shalt.err (!%p717_p10)
}
 0x10a   : > { %s721_s6 = scalar_lea.hbm %s919_s27, 256  ;;  %s725_s28 = scalar_lea.hbm %s992_s3, 512 }
 0x10b   : > { %p722_p11 = scmp.ne.s32.totalorder %s919_s27, %s721_s6  ;;  %p726_p0 = scmp.lt.u32.totalorder %s919_s27, %s992_s3 }
 0x10c   : > { %p727_p1 = scmp.lt.u32.totalorder %s725_s28, %s721_s6  ;;  %p729_p3 = scmp.lt.u32.totalorder %s721_s6, %s919_s27 }
 0x10d   : > { %p723_p12 = pnand %p722_p11, %p860_p4 }
 0x10e   : > { %p728_p2 = por %p727_p1, %p726_p0 }
 0x10f   : > { %p724_p13 = pneg %p723_p12 }
 0x110   : > { %p730_p5 = por %p729_p3, %p728_p2 }
 0x112   : > { %p731_p6 = pnand %p730_p5, %p724_p13 }
 0x114   : > { %734 = shalt.err (!%p731_p6)
}
 0x115   : > { %608 = dma.vmem_to_hbm [thread:$0]  (%p860_p4), %s921_s18, 256, %s919_s27, %s436_s15  }
 0x116 PF: > { %p618_p7 = scmp.ge.s32.totalorder %s789_s17, 2  ;;  %s480_s8 = sand.u32 1, %s769_s12  }
 0x117   : > { %s481_s9 = scalar_lea.sflag [#allocation3], %s480_s8 }
 0x118   : > { %p612_p9 = pnand %p618_p7, %p867_p8 }
 0x11a   : > { %760 = dma.done.wait (!%p612_p9), %s481_s9, 256  }
 0x11b   : > { %762 = vsyncadd (!%p612_p9), %s481_s9, 4294967040  ;;  %s490_s11 = scalar_lea.sflag [#allocation5], %s480_s8 }
 0x11c   : > { %764 = dma.done.wait (!%p612_p9), %s490_s11, 256  }
 0x11d   : > { %766 = vsyncadd (!%p612_p9), %s490_s11, 4294967040  ;;  %s20_s17 = sadd.s32 1, %s789_s17   ;;  %s995_s12 = smov %s773_s13 }
 0x11e   : > { %p17_p10 = scmp.ge.s32.totalorder %s20_s17, 4   ;;  %s996_s13 = smov %s777_s14 }
 0x11f   : > { %s997_s14 = smov %s873_s25  ;;  %s998_s15 = smov %s785_s16 }
 0x120   : > { %s999_s16 = smov %s1001_s20  ;;  %19 = sbr.rel (!%p17_p10) target bundleno = 6 (0x6), region = 80 }
 0x127   :  { %495 = vsyncpa [#allocation3], 1 }
 0x128   :  { %497 = vsyncpa [#allocation3 + $0x1], 1 }
 0x129   :  { %498 = vsyncpa [#allocation5], 1 }
 0x12a   :  { %500 = vsyncpa [#allocation5 + $0x1], 1 }

</bundles_post_ra>
